<compile_context>
chip_gen: v7x
topology: tpu7x:2x2x1
jax: 0.10.0
libtpu: 0.0.40
codegen_flags: <defaults>
</compile_context>

<pallas_src>
import functools

import jax
import jax.numpy as jnp
from jax.experimental import pallas as pl
from jax.experimental.pallas import tpu as pltpu

L2 = 0.05
_LANES = 128


def _round_up(x: int, m: int) -> int:
    return ((x + m - 1) // m) * m


def _get_int_attr(obj, names):
    for name in names:
        v = getattr(obj, name, None)
        if v is None:
            continue
        try:
            v = int(v)
        except (TypeError, ValueError):
            continue
        if v > 0:
            return v
    return None


def _num_tensorcores() -> int:
    """TensorCores per chip: 2 on v7x, 1 on v5e/v6e.  Defensive fallbacks -> 1."""
    try:
        v = _get_int_attr(pltpu.get_tpu_info(),
                          ("num_cores", "core_count", "num_tensorcores",
                           "tensorcores_per_chip", "num_cores_per_chip"))
        if v is not None and 1 <= v <= 8:
            return v
    except Exception:
        pass
    try:
        kind = jax.devices()[0].device_kind.lower()
        if "v7" in kind or "7x" in kind:
            return 2
    except Exception:
        pass
    return 1


def _vmem_capacity_bytes() -> int:
    """Physical VMEM per TensorCore; conservative (v7x) fallback if unknown."""
    try:
        v = _get_int_attr(pltpu.get_tpu_info(), ("vmem_capacity_bytes",))
        if v is not None:
            return v
    except Exception:
        pass
    return 64 * 1024 * 1024


def _npair_loss_kernel(x_ref, partial_ref, *, tb, d, nneg, tiles_per_core,
                       n_valid, l2):
    """One lane-dense (tb, N*D) tile of n-pair groups -> scalar partial sum."""
    c = pl.program_id(0)   # "parallel" TensorCore axis
    t = pl.program_id(1)   # "arbitrary" reduction axis (tiles handled by this core)

    @pl.when(t == 0)
    def _():
        partial_ref[...] = jnp.zeros_like(partial_ref)

    # Per-slice loads + casts: no whole-tile f32 copy (casts are no-ops for f32).
    anchor = x_ref[:, 0:d].astype(jnp.float32)           # (tb, D)
    pos = x_ref[:, d:2 * d].astype(jnp.float32)          # (tb, D)

    ap = jnp.sum(anchor * pos, axis=-1, keepdims=True)                   # (tb, 1)
    wsum = jnp.sum(anchor * anchor + pos * pos, axis=-1, keepdims=True)  # (tb, 1)

    # anchor.(neg_j - pos) = anchor.neg_j - anchor.pos; statically unrolled over
    # the (small, n-pair-style) number of negatives so only a couple of D-wide
    # f32 temporaries are live at any point.
    esum = jnp.zeros((tb, 1), jnp.float32)
    for j in range(nneg):
        neg_j = x_ref[:, (2 + j) * d:(3 + j) * d].astype(jnp.float32)    # (tb, D)
        s_j = jnp.sum(anchor * neg_j, axis=-1, keepdims=True)            # (tb, 1)
        # Unstabilized on purpose: matches the PyTorch reference exactly.
        esum = esum + jnp.exp(s_j - ap)

    dists = jnp.log(1.0 + esum)                                          # (tb, 1)

    # Mask groups that exist only because of batch padding.
    tile_idx = c * tiles_per_core + t
    row = tile_idx * tb + jax.lax.broadcasted_iota(jnp.int32, (tb, 1), 0)
    contrib = jnp.where(row < n_valid, dists + l2 * wsum, 0.0)

    partial_ref[...] += jnp.sum(contrib).reshape(1, 1, 1)


def npair_loss(batch: jax.Array, *, l2: float = L2, tb: int | None = None) -> jax.Array:
    """batch: (B, N, D), N >= 3 (anchor, positive, N-2 negatives). Scalar f32 loss."""
    B, N, D = batch.shape
    assert N >= 3, "need anchor + positive + at least one negative"
    nneg = N - 2
    L = N * D

    itemsize = jnp.dtype(batch.dtype).itemsize
    sublane = max(8, 32 // itemsize)              # 8 for f32, 16 for bf16, 32 for int8
    lp = _round_up(L, _LANES)                     # lane-padded row width in VMEM
    dp = max(_round_up(D, _LANES), _LANES)        # lane-padded width of one slice

    num_cores = _num_tensorcores()
    vmem_phys = _vmem_capacity_bytes()
    # ~96 MiB on 128 MiB parts (v5e/v6e), 48 MiB on 64 MiB parts (v7x).
    vmem_limit = max(min(vmem_phys * 3 // 4, 112 * 1024 * 1024), 32 * 1024 * 1024)

    if tb is None:
        # Padded per-row VMEM cost:
        #   * up to 3 pipeline buffers of the lane-padded input row
        #   * generous estimate of the simultaneously-live f32 working set
        #     (anchor/pos/neg_j slices, products, (tb,1) running sums).
        in_row = 3 * lp * itemsize
        tmp_row = 4 * (2 * nneg + 10) * dp
        budget = vmem_limit - 4 * 1024 * 1024
        tb = budget // (in_row + tmp_row)
        tb = min(tb, (16 * 1024 * 1024) // (lp * itemsize))  # <=16 MiB padded / buffer
    tb = int(tb)
    tb = min(tb, _round_up(B, sublane))           # never bigger than the padded batch
    tb = max(sublane, (tb // sublane) * sublane)  # sublane-aligned second-minor dim

    n_tiles = pl.cdiv(B, tb)
    tiles_per_core = pl.cdiv(n_tiles, num_cores)
    b_pad = num_cores * tiles_per_core * tb

    x = batch.reshape(B, L)                       # lane-dense minor dim (free reshape)
    if b_pad != B:
        x = jnp.pad(x, ((0, b_pad - B), (0, 0)))

    kernel = functools.partial(
        _npair_loss_kernel,
        tb=tb, d=D, nneg=nneg, tiles_per_core=tiles_per_core,
        n_valid=B, l2=float(l2),
    )

    in_spec_args = ((tb, L), lambda c, t: (c * tiles_per_core + t, 0))
    if tiles_per_core >= 3:
        # 3-deep input pipelining keeps two DMAs in flight (kernel is DMA-bound).
        try:
            in_spec = pl.BlockSpec(*in_spec_args, pipeline_mode=pl.Buffered(3))
        except (TypeError, AttributeError):
            in_spec = pl.BlockSpec(*in_spec_args)
    else:
        in_spec = pl.BlockSpec(*in_spec_args)

    cost = pl.CostEstimate(
        flops=int(b_pad * (2 * nneg * D + 6 * D)),
        transcendentals=int(b_pad * (nneg + 1)),
        bytes_accessed=int(b_pad * L * itemsize + num_cores * 4),
    )

    partials = pl.pallas_call(
        kernel,
        out_shape=jax.ShapeDtypeStruct((num_cores, 1, 1), jnp.float32),
        grid_spec=pltpu.PrefetchScalarGridSpec(
            num_scalar_prefetch=0,
            grid=(num_cores, tiles_per_core),
            in_specs=[in_spec],
            out_specs=pl.BlockSpec((1, 1, 1), lambda c, t: (c, 0, 0)),
        ),
        compiler_params=pltpu.CompilerParams(
            dimension_semantics=("parallel", "arbitrary"),
            vmem_limit_bytes=int(vmem_limit),
        ),
        cost_estimate=cost,
    )(x)

    # Per-core partial sums of (dist_b + l2 * wsum_b); batch-average outside.
    return jnp.sum(partials) / B


def _npair_loss_ref(batch: jax.Array, l2: float = L2) -> jax.Array:
    """Pure-JAX reference mirroring the PyTorch module exactly."""
    anchors = batch[:, 0, :]
    positives = batch[:, 1, :]
    negatives = batch[:, 2:, :]
    logits = jnp.einsum("bd,bjd->bj", anchors, negatives - positives[:, None, :])
    dists = jnp.log(1.0 + jnp.sum(jnp.exp(logits), axis=-1))
    wsums = jnp.sum(anchors ** 2 + positives ** 2, axis=-1)
    loss = dists + l2 * jnp.mean(wsums)
    return jnp.mean(loss)


if __name__ == "__main__":
    key = jax.random.PRNGKey(0)
    B, N, D = 4, 6, 32   # 4 n-pair groups: anchor + positive + 4 negatives, dim 32
    batch = jax.random.normal(key, (B, N, D), dtype=jnp.float32) * 0.1

    loss = jax.jit(npair_loss)(batch)
    jax.block_until_ready(loss)
    ref = _npair_loss_ref(batch)
    assert jnp.allclose(loss, ref, rtol=1e-5, atol=1e-5), (loss, ref)

    # Multi-tile path: exercises tail masking, cross-tile accumulation and
    # (where the API is available) the 3-deep input pipeline.
    B2 = 37
    batch2 = jax.random.normal(jax.random.PRNGKey(1), (B2, N, D), jnp.float32) * 0.1
    loss2 = jax.jit(functools.partial(npair_loss, tb=8))(batch2)
    jax.block_until_ready(loss2)
    ref2 = _npair_loss_ref(batch2)
    assert jnp.allclose(loss2, ref2, rtol=1e-5, atol=1e-5), (loss2, ref2)

    print("KERNEL_OK")
</pallas_src>

<mosaic_0001>
module attributes {stable_mosaic.version = 11 : i64} {
  func.func @_npair_loss_kernel(%arg0: i32, %arg1: i32, %arg2: memref<8x192xf32, #tpu.memory_space<vmem>>, %arg3: memref<1x1x1xf32, #tpu.memory_space<vmem>>) attributes {dimension_semantics = [#tpu.dimension_semantics<parallel>, #tpu.dimension_semantics<arbitrary>], iteration_bounds = array<i64: 1, 1>, scalar_prefetch = 0 : i64, scratch_operands = 0 : i64, tpu.core_type = #tpu.core_type<tc>, window_params = [{transform_indices = @transform_0, window_bounds = array<i64: 8, 192>}, {transform_indices = @transform_1, window_bounds = array<i64: 1, 1, 1>}]} {
    %c0_i32 = arith.constant 0 : i32
    %0 = arith.cmpi eq, %arg1, %c0_i32 : i32
    %1 = arith.extui %0 : i1 to i32
    %c0_i32_0 = arith.constant 0 : i32
    %2 = arith.cmpi ne, %1, %c0_i32_0 : i32
    scf.if %2 {
      %cst_23 = arith.constant 0.000000e+00 : f32
      %66 = vector.broadcast %cst_23 : f32 to vector<1x1x1xf32>
      %c0_24 = arith.constant 0 : index
      %c0_25 = arith.constant 0 : index
      %c0_26 = arith.constant 0 : index
      %67 = vector.load %arg3[%c0_24, %c0_25, %c0_26] : memref<1x1x1xf32, #tpu.memory_space<vmem>>, vector<1x1x1xf32>
      tpu.vector_store %arg3[%c0_24, %c0_25, %c0_26], %66 {strides = array<i32>} : memref<1x1x1xf32, #tpu.memory_space<vmem>>, vector<1x1x1xf32>,
    } else {
    }
    %c0 = arith.constant 0 : index
    %c0_1 = arith.constant 0 : index
    %3 = vector.load %arg2[%c0, %c0_1] : memref<8x192xf32, #tpu.memory_space<vmem>>, vector<8x32xf32>
    %c0_2 = arith.constant 0 : index
    %c32 = arith.constant 32 : index
    %4 = vector.load %arg2[%c0_2, %c32] : memref<8x192xf32, #tpu.memory_space<vmem>>, vector<8x32xf32>
    %5 = arith.mulf %3, %4 : vector<8x32xf32>
    %cst = arith.constant dense<0.000000e+00> : vector<8xf32>
    %6 = vector.multi_reduction <add>, %5, %cst [1] : vector<8x32xf32> to vector<8xf32>
    %7 = vector.shape_cast %6 : vector<8xf32> to vector<8x1xf32>
    %8 = arith.mulf %3, %3 : vector<8x32xf32>
    %9 = arith.mulf %4, %4 : vector<8x32xf32>
    %10 = arith.addf %8, %9 : vector<8x32xf32>
    %cst_3 = arith.constant dense<0.000000e+00> : vector<8xf32>
    %11 = vector.multi_reduction <add>, %10, %cst_3 [1] : vector<8x32xf32> to vector<8xf32>
    %12 = vector.shape_cast %11 : vector<8xf32> to vector<8x1xf32>
    %cst_4 = arith.constant 0.000000e+00 : f32
    %13 = vector.broadcast %cst_4 : f32 to vector<8x1xf32>
    %c0_5 = arith.constant 0 : index
    %c64 = arith.constant 64 : index
    %14 = vector.load %arg2[%c0_5, %c64] : memref<8x192xf32, #tpu.memory_space<vmem>>, vector<8x32xf32>
    %15 = arith.mulf %3, %14 : vector<8x32xf32>
    %cst_6 = arith.constant dense<0.000000e+00> : vector<8xf32>
    %16 = vector.multi_reduction <add>, %15, %cst_6 [1] : vector<8x32xf32> to vector<8xf32>
    %17 = vector.shape_cast %16 : vector<8xf32> to vector<8x1xf32>
    %18 = arith.subf %17, %7 : vector<8x1xf32>
    %19 = math.exp %18 : vector<8x1xf32>
    %20 = arith.addf %13, %19 : vector<8x1xf32>
    %c0_7 = arith.constant 0 : index
    %c96 = arith.constant 96 : index
    %21 = vector.load %arg2[%c0_7, %c96] : memref<8x192xf32, #tpu.memory_space<vmem>>, vector<8x32xf32>
    %22 = arith.mulf %3, %21 : vector<8x32xf32>
    %cst_8 = arith.constant dense<0.000000e+00> : vector<8xf32>
    %23 = vector.multi_reduction <add>, %22, %cst_8 [1] : vector<8x32xf32> to vector<8xf32>
    %24 = vector.shape_cast %23 : vector<8xf32> to vector<8x1xf32>
    %25 = arith.subf %24, %7 : vector<8x1xf32>
    %26 = math.exp %25 : vector<8x1xf32>
    %27 = arith.addf %20, %26 : vector<8x1xf32>
    %c0_9 = arith.constant 0 : index
    %c128 = arith.constant 128 : index
    %28 = vector.load %arg2[%c0_9, %c128] : memref<8x192xf32, #tpu.memory_space<vmem>>, vector<8x32xf32>
    %29 = arith.mulf %3, %28 : vector<8x32xf32>
    %cst_10 = arith.constant dense<0.000000e+00> : vector<8xf32>
    %30 = vector.multi_reduction <add>, %29, %cst_10 [1] : vector<8x32xf32> to vector<8xf32>
    %31 = vector.shape_cast %30 : vector<8xf32> to vector<8x1xf32>
    %32 = arith.subf %31, %7 : vector<8x1xf32>
    %33 = math.exp %32 : vector<8x1xf32>
    %34 = arith.addf %27, %33 : vector<8x1xf32>
    %c0_11 = arith.constant 0 : index
    %c160 = arith.constant 160 : index
    %35 = vector.load %arg2[%c0_11, %c160] : memref<8x192xf32, #tpu.memory_space<vmem>>, vector<8x32xf32>
    %36 = arith.mulf %3, %35 : vector<8x32xf32>
    %cst_12 = arith.constant dense<0.000000e+00> : vector<8xf32>
    %37 = vector.multi_reduction <add>, %36, %cst_12 [1] : vector<8x32xf32> to vector<8xf32>
    %38 = vector.shape_cast %37 : vector<8xf32> to vector<8x1xf32>
    %39 = arith.subf %38, %7 : vector<8x1xf32>
    %40 = math.exp %39 : vector<8x1xf32>
    %41 = arith.addf %34, %40 : vector<8x1xf32>
    %cst_13 = arith.constant 1.000000e+00 : f32
    %42 = vector.broadcast %cst_13 : f32 to vector<8x1xf32>
    %43 = arith.addf %42, %41 : vector<8x1xf32>
    %44 = math.log %43 : vector<8x1xf32>
    %c1_i32 = arith.constant 1 : i32
    %45 = arith.muli %arg0, %c1_i32 : i32
    %46 = arith.addi %45, %arg1 : i32
    %c8_i32 = arith.constant 8 : i32
    %47 = arith.muli %46, %c8_i32 : i32
    %48 = tpu.iota {dimensions = array<i32: 0>} : vector<8x1xi32>
    %49 = vector.broadcast %47 : i32 to vector<8x1xi32>
    %50 = arith.addi %49, %48 : vector<8x1xi32>
    %c4_i32 = arith.constant 4 : i32
    %51 = vector.broadcast %c4_i32 : i32 to vector<8x1xi32>
    %52 = arith.cmpi slt, %50, %51 : vector<8x1xi32>
    %cst_14 = arith.constant 5.000000e-02 : f32
    %53 = vector.broadcast %cst_14 : f32 to vector<8x1xf32>
    %54 = arith.mulf %53, %12 : vector<8x1xf32>
    %55 = arith.addf %44, %54 : vector<8x1xf32>
    %cst_15 = arith.constant 0.000000e+00 : f32
    %56 = vector.broadcast %cst_15 : f32 to vector<8x1xf32>
    %57 = arith.select %52, %55, %56 : vector<8x1xi1>, vector<8x1xf32>
    %c0_16 = arith.constant 0 : index
    %c0_17 = arith.constant 0 : index
    %c0_18 = arith.constant 0 : index
    %58 = vector.load %arg3[%c0_16, %c0_17, %c0_18] : memref<1x1x1xf32, #tpu.memory_space<vmem>>, vector<1x1x1xf32>
    %59 = vector.shape_cast %57 : vector<8x1xf32> to vector<1x8x1xf32>
    %cst_19 = arith.constant dense<0.000000e+00> : vector<1xf32>
    %60 = vector.multi_reduction <add>, %59, %cst_19 [1, 2] : vector<1x8x1xf32> to vector<1xf32>
    %61 = vector.shape_cast %60 : vector<1xf32> to vector<1x1x1xf32>
    %62 = vector.extract %61[0, 0, 0] : f32 from vector<1x1x1xf32>
    %63 = vector.broadcast %62 : f32 to vector<1x1x1xf32>
    %64 = arith.addf %58, %63 : vector<1x1x1xf32>
    %c0_20 = arith.constant 0 : index
    %c0_21 = arith.constant 0 : index
    %c0_22 = arith.constant 0 : index
    %65 = vector.load %arg3[%c0_20, %c0_21, %c0_22] : memref<1x1x1xf32, #tpu.memory_space<vmem>>, vector<1x1x1xf32>
    tpu.vector_store %arg3[%c0_20, %c0_21, %c0_22], %64 {strides = array<i32>} : memref<1x1x1xf32, #tpu.memory_space<vmem>>, vector<1x1x1xf32>,
    return
  }
  func.func @transform_0(%arg0: i32, %arg1: i32) -> (i32, i32) {
    %c1_i32 = arith.constant 1 : i32
    %0 = arith.muli %arg0, %c1_i32 : i32
    %1 = arith.addi %0, %arg1 : i32
    %c0_i32 = arith.constant 0 : i32
    %c0_i32_0 = arith.constant 0 : i32
    return %1, %c0_i32 : i32, i32
  }
  func.func @transform_1(%arg0: i32, %arg1: i32) -> (i32, i32, i32) {
    %c0_i32 = arith.constant 0 : i32
    %c0_i32_0 = arith.constant 0 : i32
    %c0_i32_1 = arith.constant 0 : i32
    return %arg0, %c0_i32, %c0_i32_0 : i32, i32, i32
  }
}

</mosaic_0001>

<bundles_post_ra>
// kernel: npair_loss.1
= control target key start
LH: loop header
LB: loop body
LE: loop exit
PB: predicated region body
PF: predicated region fallthrough
CT: control target
= control target key end

     0   :  { %s187_s8 = smov 96   ;;  %s228_s0 = inlined_call_operand.vmem [shape: f32[8,192], index: 0, kind: input, shape index: {}]   ;;  %s229_s1 = inlined_call_operand.hbm [shape: f32[1,1,1], index: 1, kind: output, shape index: {}]  }
   0x1   :  { %v35_v0 = vld [vmem:[%s228_s0] sm:$0xff] }
   0x2   :  { %37 = vrot.lane.b32.xlu0 %v35_v0, %s187_s8 }
   0x3   :  { %6 = vsyncpa [#allocation3], 0  ;;  %s188_s9 = smov 32   ;;  %v76_v1 = vld [vmem:[%s228_s0 + $0x8] sm:$0xff]  ;;  %s189_s12 = smov 64   ;;  %v45_v2 = vmul.f32 %v35_v0, %v35_v0  ;;  %vm41_vm0 = vcmask 261120   ;;  %v102_v41 = vlaneseq }
   0x4   :  { %65 = vrot.lane.b32.xlu1 %v35_v0, %s188_s9  ;;  %v77_v6 = vmul.f32 %v76_v1, %v35_v0  ;;  %vm111_vm2 = vcmask 7168   ;;  %vm33_vm3 = vcmask 0   ;;  %v190_v50 = vmov 0.0   ;;  %s191_s0 = smov [#allocation2]  }
   0x5   :  { %v103_v43 = vshrl.u32 %v102_v41, 7  ;;  %34 = vst.msk [vmem:[#allocation2] sm:$0x1] %vm33_vm3, %v190_v50  ;;  %s132_s13 = sshll.u32 %s191_s0, 4  ;;  %s133_s13 = int_to_ptr.vmem [resolvable:$true] %s132_s13 }
   0x6   :  { %54 = vrot.lane.b32.xlu0 %v35_v0, %s189_s12  ;;  %v78_v11 = vsel %vm41_vm0, %v77_v6, 0.0  ;;  %s163_s15 = scalar_lea.vmem %s133_s13, 16  ;;  %s167_s16 = scalar_lea.vmem %s133_s13, 32 }
   0x7   :  { %vm106_vm1 = vcmp.lt.s32.totalorder %v103_v43, 4  ;;  %p164_p0 = scmp.ne.s32.totalorder %s133_s13, %s163_s15  ;;  %p168_p1 = scmp.lt.s32.totalorder %s133_s13, %s133_s13 }
   0x8   :  { %86 = vrot.lane.b32.xlu1 %v76_v1, %s187_s8  ;;  %p169_p2 = scmp.lt.s32.totalorder %s167_s16, %s163_s15 }
   0xa   :  { %47 = vrot.lane.b32.xlu0 %v45_v2, %s187_s8  ;;  %p170_p3 = por %p169_p2, %p168_p1 }
   0xc   :  { %v110_v58 = vld [vmem:[#allocation2] sm:$0x1]  ;;  %p171_p4 = pnand %p170_p3, %p164_p0 }
  0x74   :  { %v38_v3 = vpop.permute.xlu0 %37 }
  0x75   :  { %v40_v4 = vmul.f32 %v38_v3, %v35_v0 }
  0x76   :  { %v66_v5 = vpop.permute.xlu1 %65 }
  0x77   :  { %v42_v7 = vsel %vm41_vm0, %v40_v4, 0.0  ;;  %v68_v10 = vmul.f32 %v66_v5, %v35_v0 }
  0x78   :  { %43 = vadd.xlane.f32.xlu1 %v42_v7  ;;  %v55_v8 = vpop.permute.xlu0 %54 }
  0x79   :  { %v57_v9 = vmul.f32 %v55_v8, %v35_v0  ;;  %v69_v16 = vsel %vm41_vm0, %v68_v10, 0.0 }
  0x7a   :  { %v87_v12 = vpop.permute.xlu1 %86 }
  0x7b   :  { %v58_v13 = vsel %vm41_vm0, %v57_v9, 0.0  ;;  %v89_v15 = vmul.f32 %v87_v12, %v35_v0 }
  0x7c   :  { %79 = vadd.xlane.f32.xlu1 %v78_v11  ;;  %59 = vadd.xlane.f32.xlu0 %v58_v13  ;;  %v48_v14 = vpop.permute.xlu0 %47 }
  0x7d   :  { %v50_v17 = vadd.f32 %v48_v14, %v45_v2  ;;  %v90_v19 = vsel %vm41_vm0, %v89_v15, 0.0 }
  0x7f   :  { %v51_v18 = vsel %vm41_vm0, %v50_v17, 0.0 }
  0x80   :  { %70 = vadd.xlane.f32.xlu0 %v69_v16  ;;  %52 = vadd.xlane.f32.xlu1 %v51_v18 }
  0x84   :  { %91 = vadd.xlane.f32.xlu0 %v90_v19 }
 0x105   :  { %v44_v20 = vpop.xlane.xlu1 %43 }
 0x109   :  { %v80_v21 = vpop.xlane.xlu1 %79  ;;  %v60_v22 = vpop.xlane.xlu0 %59 }
 0x10a   :  { %v61_v23 = vsub.f32 %v60_v22, %v44_v20  ;;  %v81_v24 = vsub.f32 %v80_v21, %v44_v20 }
 0x10c   :  { %v62_v25 = vmul.f32 1.442695, %v61_v23  ;;  %v82_v28 = vmul.f32 1.442695, %v81_v24 }
 0x10d   :  { %v71_v26 = vpop.xlane.xlu0 %70  ;;  %v53_v42 = vpop.xlane.xlu1 %52 }
 0x10e   :  { %v72_v27 = vsub.f32 %v71_v26, %v44_v20  ;;  %153 = vpow2.f32 %v62_v25  ;;  %v107_v44 = vmul.f32 0.05, %v53_v42 }
 0x110   :  { %v73_v29 = vmul.f32 1.442695, %v72_v27 }
 0x111   :  { %v92_v30 = vpop.xlane.xlu0 %91 }
 0x112   :  { %155 = vpow2.f32 %v73_v29  ;;  %v93_v31 = vsub.f32 %v92_v30, %v44_v20 }
 0x113   :  { %157 = vpow2.f32 %v82_v28 }
 0x114   :  { %v94_v32 = vmul.f32 1.442695, %v93_v31 }
 0x116   :  { %159 = vpow2.f32 %v94_v32 }
 0x118   :  { %v154_v33 = vpop.eup %153 }
 0x11c   :  { %v156_v34 = vpop.eup %155 }
 0x11d   :  { %v75_v35 = vadd.f32 %v156_v34, %v154_v33  ;;  %v158_v36 = vpop.eup %157 }
 0x11f   :  { %v84_v37 = vadd.f32 %v158_v36, %v75_v35 }
 0x120   :  { %v160_v38 = vpop.eup %159 }
 0x121   :  { %v96_v39 = vadd.f32 %v160_v38, %v84_v37 }
 0x123   :  { %v97_v40 = vadd.f32 1.0, %v96_v39 }
 0x125   :  { %161 = vlog2.f32 %v97_v40 }
 0x12f   :  { %v162_v45 = vpop.eup %161 }
 0x130   :  { %v99_v46 = vmul.f32 0.6931472, %v162_v45 }
 0x132   :  { %v108_v47 = vadd.f32 %v107_v44, %v99_v46 }
 0x134   :  { %v109_v48 = vsel %vm106_vm1, %v108_v47, 0.0 }
 0x135   :  { %v112_v49 = vsel %vm111_vm2, %v109_v48, 0.0 }
 0x136   :  { %113 = vadd.xlane.f32.xlu0 %v112_v49 }
 0x1c3   :  { %v114_v51 = vpop.xlane.xlu0 %113 }
 0x1c4   :  { %v115_v52 = vrot.slane %v114_v51, 4 }
 0x1c6   :  { %v116_v53 = vadd.f32 %v115_v52, %v114_v51 }
 0x1c8   :  { %v117_v54 = vrot.slane %v116_v53, 2 }
 0x1ca   :  { %v118_v55 = vadd.f32 %v117_v54, %v116_v53 }
 0x1cc   :  { %v119_v56 = vrot.slane %v118_v55, 1 }
 0x1ce   :  { %v120_v57 = vadd.f32 %v119_v56, %v118_v55 }
 0x1d0   :  { %146 = vpush %v120_v57 }
 0x201   :  { %s147_s14 = spop %146 }
 0x202   :  { %v122_v59 = vstv %s147_s14 }
 0x203   :  { %v123_v60 = vadd.f32 %v122_v59, %v110_v58 }
 0x205   :  { %125 = vst.msk [vmem:[#allocation2] sm:$0x1] %vm33_vm3, %v123_v60 }
 0x206   :  { %174 = shalt.err (!%p171_p4)
}
 0x207   :  { %s175_s19 = scalar_lea.hbm %s229_s1, 16 }
 0x208   :  { %p176_p5 = scmp.ne.s32.totalorder %s229_s1, %s175_s19  ;;  %p179_p6 = scmp.lt.u32.totalorder %s175_s19, %s229_s1 }
 0x20a   :  { %p181_p7 = pnand %p179_p6, %p176_p5 }
 0x20c   :  { %184 = shalt.err (!%p181_p7)
}
 0x20d   :  { %135 = dma.vmem_to_hbm [thread:$0]  %s133_s13, 16, %s229_s1, [#allocation3]  }
 0x20e   :  { %185 = dma.done.wait [#allocation3], 16  }
 0x20f   :  { %186 = vsyncadd [#allocation3], 4294967280 }
 0x210   :  { %139 = vsyncpa [#allocation3], 1 }

</bundles_post_ra>
